<compile_context>
chip_gen: v5e
topology: v5e:2x2
jax: 0.10.0
libtpu: 0.0.40
codegen_flags: <defaults>
</compile_context>

<pallas_src>
import jax
import jax.numpy as jnp
import numpy as np
from jax.experimental import pallas as pl
from jax.experimental.pallas import tpu as pltpu


def _ce_kernel(logits_ref, targets_ref, nll_ref):
    # logits_ref: (C, T) native dtype ; targets_ref: (1, T) int32
    hw_step = pl.program_id(1)

    @pl.when(hw_step == 0)
    def _():
        nll_ref[...] = jnp.zeros_like(nll_ref)

    x = logits_ref[...].astype(jnp.float32)                   # (C, T)
    t = targets_ref[...]                                      # (1, T) int32
    C = x.shape[0]

    # stable logsumexp over the class (sublane) axis
    m = jnp.max(x, axis=0, keepdims=True)                     # (1, T)
    s = jnp.sum(jnp.exp(x - m), axis=0, keepdims=True)        # (1, T)
    lse = m + jnp.log(s)                                      # (1, T)

    # gather x at the target class via a one-hot compare (scatter-free)
    cls = jax.lax.broadcasted_iota(jnp.int32, (C, x.shape[1]), 0)
    mask = (cls == t).astype(jnp.float32)                     # (C, T)
    x_t = jnp.sum(mask * x, axis=0, keepdims=True)            # (1, T)

    # padded pixels carry target == -1 -> mask is all-zero and valid == 0
    valid = (t >= 0).astype(jnp.float32)                      # (1, T)

    # per-pixel NLL = logsumexp(x) - x[target]; accumulate the tile's sum
    nll_ref[...] += jnp.sum(valid * (lse - x_t)).reshape(1, 1, 1)


def _round_up(x, m):
    return ((x + m - 1) // m) * m


def cross_entropy_loss_2d(inputs, targets, weight=None):
    """Equivalent of CrossEntropyLoss2d(weight=None).forward(inputs, targets).

    inputs:  (N, C, H, W) float logits (any float dtype; read in native dtype)
    targets: (N, H, W)    int class indices in [0, C)
    returns: scalar float32
    """
    # TODO(synk): per-class NLL `weight` rescaling not implemented (weight=None path only).
    del weight
    N, C, H, W = inputs.shape
    HW = H * W

    logits = inputs.reshape(N, C, HW)                 # keep native dtype
    tgt = targets.reshape(N, 1, HW).astype(jnp.int32)

    # Lane tile: multiple of 128, capped at 2048 (HBM roofline plateaus well
    # below this; keeps 2x double-buffered blocks + temporaries tiny on v7x).
    TILE_HW = min(2048, _round_up(HW, 128))
    HW_pad = _round_up(HW, TILE_HW)
    if HW_pad != HW:
        pad = HW_pad - HW
        logits = jnp.pad(logits, ((0, 0), (0, 0), (0, pad)))
        tgt = jnp.pad(tgt, ((0, 0), (0, 0), (0, pad)), constant_values=-1)
    num_hw_tiles = HW_pad // TILE_HW

    nll_sum = pl.pallas_call(
        _ce_kernel,
        out_shape=jax.ShapeDtypeStruct((N, 1, 1), jnp.float32),
        grid=(N, num_hw_tiles),
        in_specs=[
            pl.BlockSpec((pl.Squeezed(), C, TILE_HW), lambda n, h: (n, 0, h)),
            pl.BlockSpec((pl.Squeezed(), 1, TILE_HW), lambda n, h: (n, 0, h)),
        ],
        out_specs=pl.BlockSpec((1, 1, 1), lambda n, h: (n, 0, 0)),
        compiler_params=pltpu.CompilerParams(
            dimension_semantics=("parallel", "arbitrary"),
            vmem_limit_bytes=32 * 1024 * 1024,
        ),
    )(logits, tgt)

    # NLLLoss(reduction='mean') over all N*H*W pixels
    return jnp.sum(nll_sum) / jnp.float32(N * HW)


def _reference(inputs, targets):
    """Pure-JAX reference replicating the PyTorch forward exactly."""
    logsm = jax.nn.log_softmax(inputs.astype(jnp.float32), axis=1)
    nll = -jnp.take_along_axis(logsm, targets[:, None].astype(jnp.int32), axis=1)
    return jnp.mean(nll)


if __name__ == "__main__":
    key = jax.random.PRNGKey(0)
    k1, k2 = jax.random.split(key)

    N, C, H, W = 2, 4, 16, 16
    inputs = jax.random.normal(k1, (N, C, H, W), dtype=jnp.float32)
    targets = jax.random.randint(k2, (N, H, W), 0, C, dtype=jnp.int32)

    loss = jax.block_until_ready(cross_entropy_loss_2d(inputs, targets))
    ref = jax.block_until_ready(_reference(inputs, targets))
    np.testing.assert_allclose(np.asarray(loss), np.asarray(ref), rtol=1e-5, atol=1e-5)

    print("KERNEL_OK")
</pallas_src>

<mosaic_0001>
module attributes {stable_mosaic.version = 11 : i64} {
  func.func @_ce_kernel(%arg0: i32, %arg1: i32, %arg2: memref<1x4x256xf32, #tpu.memory_space<vmem>>, %arg3: memref<1x1x256xi32, #tpu.memory_space<vmem>>, %arg4: memref<1x1x1xf32, #tpu.memory_space<vmem>>) attributes {dimension_semantics = [#tpu.dimension_semantics<parallel>, #tpu.dimension_semantics<arbitrary>], iteration_bounds = array<i64: 2, 1>, scalar_prefetch = 0 : i64, scratch_operands = 0 : i64, tpu.core_type = #tpu.core_type<tc>, window_params = [{transform_indices = @transform_0, window_bounds = array<i64: 1, 4, 256>}, {transform_indices = @transform_1, window_bounds = array<i64: 1, 1, 256>}, {transform_indices = @transform_2, window_bounds = array<i64: 1, 1, 1>}]} {
    %c0_i32 = arith.constant 0 : i32
    %0 = arith.cmpi eq, %arg1, %c0_i32 : i32
    %1 = arith.extui %0 : i1 to i32
    %c0_i32_0 = arith.constant 0 : i32
    %2 = arith.cmpi ne, %1, %c0_i32_0 : i32
    scf.if %2 {
      %cst_16 = arith.constant 0.000000e+00 : f32
      %38 = vector.broadcast %cst_16 : f32 to vector<1x1x1xf32>
      %c0_17 = arith.constant 0 : index
      %c0_18 = arith.constant 0 : index
      %c0_19 = arith.constant 0 : index
      %39 = vector.load %arg4[%c0_17, %c0_18, %c0_19] : memref<1x1x1xf32, #tpu.memory_space<vmem>>, vector<1x1x1xf32>
      tpu.vector_store %arg4[%c0_17, %c0_18, %c0_19], %38 {strides = array<i32>} : memref<1x1x1xf32, #tpu.memory_space<vmem>>, vector<1x1x1xf32>,
    } else {
    }
    %c0 = arith.constant 0 : index
    %c0_1 = arith.constant 0 : index
    %c0_2 = arith.constant 0 : index
    %3 = vector.load %arg2[%c0, %c0_1, %c0_2] : memref<1x4x256xf32, #tpu.memory_space<vmem>>, vector<1x4x256xf32>
    %4 = vector.shape_cast %3 : vector<1x4x256xf32> to vector<4x256xf32>
    %c0_3 = arith.constant 0 : index
    %c0_4 = arith.constant 0 : index
    %c0_5 = arith.constant 0 : index
    %5 = vector.load %arg3[%c0_3, %c0_4, %c0_5] : memref<1x1x256xi32, #tpu.memory_space<vmem>>, vector<1x1x256xi32>
    %6 = vector.shape_cast %5 : vector<1x1x256xi32> to vector<1x256xi32>
    %cst = arith.constant dense<0xFF800000> : vector<256xf32>
    %7 = vector.multi_reduction <maximumf>, %4, %cst [0] : vector<4x256xf32> to vector<256xf32>
    %8 = vector.shape_cast %7 : vector<256xf32> to vector<1x256xf32>
    %9 = vector.broadcast %8 : vector<1x256xf32> to vector<4x256xf32>
    %10 = arith.subf %4, %9 : vector<4x256xf32>
    %11 = math.exp %10 : vector<4x256xf32>
    %cst_6 = arith.constant dense<0.000000e+00> : vector<256xf32>
    %12 = vector.multi_reduction <add>, %11, %cst_6 [0] : vector<4x256xf32> to vector<256xf32>
    %13 = vector.shape_cast %12 : vector<256xf32> to vector<1x256xf32>
    %14 = math.log %13 : vector<1x256xf32>
    %15 = arith.addf %8, %14 : vector<1x256xf32>
    %16 = tpu.iota {dimensions = array<i32: 0>} : vector<4x256xi32>
    %17 = vector.broadcast %6 : vector<1x256xi32> to vector<4x256xi32>
    %18 = arith.cmpi eq, %16, %17 : vector<4x256xi32>
    %19 = arith.extui %18 : vector<4x256xi1> to vector<4x256xi32>
    %20 = arith.sitofp %19 : vector<4x256xi32> to vector<4x256xf32>
    %21 = arith.mulf %20, %4 : vector<4x256xf32>
    %cst_7 = arith.constant dense<0.000000e+00> : vector<256xf32>
    %22 = vector.multi_reduction <add>, %21, %cst_7 [0] : vector<4x256xf32> to vector<256xf32>
    %23 = vector.shape_cast %22 : vector<256xf32> to vector<1x256xf32>
    %c0_i32_8 = arith.constant 0 : i32
    %24 = vector.broadcast %c0_i32_8 : i32 to vector<1x256xi32>
    %25 = arith.cmpi sge, %6, %24 : vector<1x256xi32>
    %26 = arith.extui %25 : vector<1x256xi1> to vector<1x256xi32>
    %27 = arith.sitofp %26 : vector<1x256xi32> to vector<1x256xf32>
    %c0_9 = arith.constant 0 : index
    %c0_10 = arith.constant 0 : index
    %c0_11 = arith.constant 0 : index
    %28 = vector.load %arg4[%c0_9, %c0_10, %c0_11] : memref<1x1x1xf32, #tpu.memory_space<vmem>>, vector<1x1x1xf32>
    %29 = arith.subf %15, %23 : vector<1x256xf32>
    %30 = arith.mulf %27, %29 : vector<1x256xf32>
    %31 = vector.shape_cast %30 : vector<1x256xf32> to vector<1x1x256xf32>
    %cst_12 = arith.constant dense<0.000000e+00> : vector<1xf32>
    %32 = vector.multi_reduction <add>, %31, %cst_12 [1, 2] : vector<1x1x256xf32> to vector<1xf32>
    %33 = vector.shape_cast %32 : vector<1xf32> to vector<1x1x1xf32>
    %34 = vector.extract %33[0, 0, 0] : f32 from vector<1x1x1xf32>
    %35 = vector.broadcast %34 : f32 to vector<1x1x1xf32>
    %36 = arith.addf %28, %35 : vector<1x1x1xf32>
    %c0_13 = arith.constant 0 : index
    %c0_14 = arith.constant 0 : index
    %c0_15 = arith.constant 0 : index
    %37 = vector.load %arg4[%c0_13, %c0_14, %c0_15] : memref<1x1x1xf32, #tpu.memory_space<vmem>>, vector<1x1x1xf32>
    tpu.vector_store %arg4[%c0_13, %c0_14, %c0_15], %36 {strides = array<i32>} : memref<1x1x1xf32, #tpu.memory_space<vmem>>, vector<1x1x1xf32>,
    return
  }
  func.func @transform_0(%arg0: i32, %arg1: i32) -> (i32, i32, i32) {
    %c0_i32 = arith.constant 0 : i32
    %c0_i32_0 = arith.constant 0 : i32
    return %arg0, %c0_i32, %arg1 : i32, i32, i32
  }
  func.func @transform_1(%arg0: i32, %arg1: i32) -> (i32, i32, i32) {
    %c0_i32 = arith.constant 0 : i32
    %c0_i32_0 = arith.constant 0 : i32
    return %arg0, %c0_i32, %arg1 : i32, i32, i32
  }
  func.func @transform_2(%arg0: i32, %arg1: i32) -> (i32, i32, i32) {
    %c0_i32 = arith.constant 0 : i32
    %c0_i32_0 = arith.constant 0 : i32
    %c0_i32_1 = arith.constant 0 : i32
    return %arg0, %c0_i32, %c0_i32_0 : i32, i32, i32
  }
}

</mosaic_0001>

<bundles_post_ra>
// kernel: tpu_custom_call.1
= control target key start
LH: loop header
LB: loop body
LE: loop exit
PB: predicated region body
PF: predicated region fallthrough
CT: control target
= control target key end

     0   :  { %7 = vsyncpa [#allocation3], 0  ;;  %s774_s0 = inlined_call_operand.hbm [shape: f32[2,4,256], index: 0, kind: input, shape index: {}]   ;;  %s775_s1 = inlined_call_operand.hbm [shape: s32[2,1,256], index: 1, kind: input, shape index: {}]   ;;  %s776_s2 = inlined_call_operand.vmem [shape: f32[2,1,1], index: 2, kind: output, shape index: {}]  }
   0x1   :  { %9 = vsyncpa [#allocation3 + $0x1], 0 }
   0x2   :  { %10 = vsyncpa [#allocation5], 0 }
   0x3   :  { %12 = vsyncpa [#allocation5 + $0x1], 0  ;;  %s663_s9 = smov 0   ;;  %s665_s10 = smov 0  }
   0x4   :  { %s667_s11 = smov 0   ;;  %s669_s12 = smov 0  }
   0x5   :  { %s671_s13 = smov 0   ;;  %s673_s14 = smov 0  }
   0x6 LB: > { %s444_s15 = sadd.s32 4294967295, %s645_s14   ;;  %s30_s16 = sadd.s32 1, %s641_s13  ;;  %s645_s14 = sphi %s673_s14, %s18_s14   ;;  %s641_s13 = sphi %s671_s13, %s784_s13   ;;  %s637_s12 = sphi %s669_s12, %s783_s12   ;;  %s633_s11 = sphi %s667_s11, %s782_s11   ;;  %s629_s10 = sphi %s665_s10, %s781_s10   ;;  %s625_s9 = sphi %s663_s9, %s780_s9  }
   0x7   : > { %p32_p0 = scmp.ge.s32.totalorder %s30_s16, 2  ;;  %s39_s17 = sadd.s32 1, %s633_s11 }
   0x8   : > { %p46_p1 = scmp.ne.s32.totalorder %s633_s11, %s629_s10  ;;  %p47_p2 = scmp.eq.s32.totalorder %s645_s14, 0 }
   0x9   : > { %s786_s16 = smov (%p32_p0, %s30_s16), 0  ;;  %p52_p4 = scmp.ne.s32.totalorder %s629_s10, %s625_s9 }
   0xa   : > { %p699_p3 = por %p47_p2, %p46_p1  ;;  %s34_s19 = ssub.s32 %s641_s13, %s786_s16 }
   0xb   : > { %p53_p5 = scmp.eq.s32.totalorder %s444_s15, 0  ;;  %p37_p6 = scmp.eq.s32.totalorder %s34_s19, 0 }
   0xc   : > { %p475_p8 = scmp.lt.s32.totalorder %s645_s14, 2  ;;  %s130_s22 = sand.u32 1, %s633_s11  }
   0xd   : > { %p706_p7 = por %p53_p5, %p52_p4  ;;  %s461_s23 = sshll.u32 %s641_s13, 3 }
   0xe   : > { %s712_s21 = scalar_select %p37_p6, %s633_s11, %s39_s17  }
   0xf   : > { %s448_s24 = sshll.u32 %s130_s22, 3  ;;  %s141_s27 = scalar_lea.hbm %s774_s0, %s461_s23 }
  0x10   : > { %s143_s28 = sshll.u32 %s141_s27, 4  ;;  %s134_s29 = scalar_lea.vmem [#allocation2], %s448_s24  ;;  %s144_s28 = int_to_ptr.hbm [resolvable:$true] %s143_s28 }
  0x11   : > { %s145_s30 = sshll.u32 %s134_s29, 4  ;;  %p721_p9 = pnand %p475_p8, %p699_p3  ;;  %s146_s30 = int_to_ptr.vmem [resolvable:$true] %s145_s30 }
  0x12   : > { %p453_p10 = scmp.ge.s32.totalorder %s645_s14, 1  ;;  %p171_p11 = scmp.lt.s32.totalorder %s645_s14, 3 }
  0x13   : > { %s451_s4 = sshll.u32 %s130_s22, 1  ;;  %s131_s5 = scalar_lea.sflag [#allocation3], %s130_s22 }
  0x14   : > { %471 = dma.hbm_to_vmem [thread:$0]  (!%p721_p9), %s144_s28, 128, %s146_s30, %s131_s5  }
  0x15   : > { %p172_p12 = pnand %p453_p10, %p171_p11  ;;  %s452_s6 = sshll.u32 %s641_s13, 1 }
  0x16   : > { %s156_s7 = scalar_lea.vmem [#allocation4], %s451_s4  ;;  %s162_s17 = scalar_lea.hbm %s775_s1, %s452_s6 }
  0x17   : > { %s166_s8 = sshll.u32 %s156_s7, 4  ;;  %s164_s18 = sshll.u32 %s162_s17, 4  ;;  %s167_s8 = int_to_ptr.vmem [resolvable:$true] %s166_s8  ;;  %s165_s18 = int_to_ptr.hbm [resolvable:$true] %s164_s18 }
  0x18   : > { %s153_s19 = scalar_lea.sflag [#allocation5], %s130_s22  ;;  %175 = sbr.rel (%p172_p12) target bundleno = 296 (0x128), region = 28 }
  0x19   : > { %474 = dma.hbm_to_vmem [thread:$0]  (!%p721_p9), %s165_s18, 32, %s167_s8, %s153_s19  }
  0x1a   : > { %s177_s23 = sand.u32 (!%p172_p12), 1, %s629_s10  }
  0x1b   : > { %s454_s24 = sshll.u32 (!%p172_p12), %s177_s23, 3  ;;  %s178_s25 = scalar_lea.sflag (!%p172_p12), [#allocation3], %s177_s23 }
  0x1c   : > { %s181_s26 = scalar_lea.vmem (!%p172_p12), [#allocation2], %s454_s24 }
  0x1d   : > { %616 = dma.done.wait (%p706_p7), %s178_s25, 128  }
  0x1e   : > { %618 = vsyncadd (%p706_p7), %s178_s25, 4294967168  ;;  %s455_s27 = sshll.u32 %s177_s23, 1  ;;  %s188_s28 = scalar_lea.sflag [#allocation5], %s177_s23 }
  0x1f   : > { %s191_s29 = scalar_lea.vmem [#allocation4], %s455_s27 }
  0x20   : > { %620 = dma.done.wait (%p706_p7), %s188_s28, 32  }
  0x21   : > { %622 = vsyncadd (%p706_p7), %s188_s28, 4294967264  ;;  %v227_v0 = vld [vmem:[%s181_s26] sm:$0xff]  ;;  %vm235_vm0 = vcmask 1043456   ;;  %v284_v22 = vlaneseq  ;;  %v228_v23 = vld [vmem:[%s191_s29] sm:$0x3]  ;;  %v647_v37 = vmov 0.0  }
  0x22   : > { %230 = vst [vmem:[#allocation1] ss:$2 sm:$0xff] %v227_v0  ;;  %v286_v25 = vperm.slane %v228_v23, 0  ;;  %v287_v26 = vperm.slane %v228_v23, 1  ;;  %vm315_vm3 = vcmp.ge.s32.totalorder %v228_v23, 0  ;;  %vm324_vm4 = vcmask 1040384  }
  0x23   : > { %v285_v24 = vshrl.u32 %v284_v22, 7  ;;  %p218_p13 = scmp.lt.s32.totalorder %s637_s12, 1  ;;  %vm225_vm5 = vcmask 0  }
  0x25   : > { %vm288_vm1 = vcmp.eq.s32.totalorder %v285_v24, %v286_v25  ;;  %vm289_vm2 = vcmp.eq.s32.totalorder %v285_v24, %v287_v26  ;;  %s788_s12 = smov (!%p218_p13, %s637_s12), 1 }
  0x26   : > { %v456_v38 = vsel %vm288_vm1, 1.0, %v647_v37  ;;  %v457_v39 = vsel %vm289_vm2, 1.0, %v647_v37  ;;  %s220_s30 = scalar_lea.vmem %s776_s2, %s788_s12 }
  0x27   : > { %226 = vst.msk [vmem:[%s220_s30] sm:$0x1] %vm225_vm5, %v647_v37 }
  0x29   : > { %v231_v1 = vld.sshfl [vmem:[#allocation1] sm:$0xff pattern:$0x75316420]  ;;  %v232_v2 = vld.sshfl [vmem:[#allocation1 + $0x8] sm:$0xff pattern:$0x75316420] }
  0x2a   : > { %v236_v3 = vsel %vm235_vm0, %v231_v1, -inf  ;;  %v243_v4 = vsel %vm235_vm0, %v232_v2, -inf }
  0x2b   : > { %v237_v5 = vrot.slane %v236_v3, 4  ;;  %v244_v6 = vrot.slane %v243_v4, 4 }
  0x2d   : > { %v238_v7 = vmax.f32 %v236_v3, %v237_v5  ;;  %v245_v8 = vmax.f32 %v243_v4, %v244_v6 }
  0x2e   : > { %v318_v24 = vld [vmem:[%s220_s30] sm:$0x1] }
  0x2f   : > { %v239_v9 = vrot.slane %v238_v7, 2  ;;  %v246_v10 = vrot.slane %v245_v8, 2 }
  0x31   : > { %v240_v11 = vmax.f32 %v238_v7, %v239_v9  ;;  %v247_v12 = vmax.f32 %v245_v8, %v246_v10  ;;  %v458_v8 = vsel %vm315_vm3, 1.0, %v647_v37 }
  0x33   : > { %v241_v13 = vrot.slane %v240_v11, 1  ;;  %v248_v14 = vrot.slane %v247_v12, 1 }
  0x35   : > { %v242_v15 = vmax.f32 %v240_v11, %v241_v13  ;;  %v249_v16 = vmax.f32 %v247_v12, %v248_v14 }
  0x37   : > { %v252_v17 = vrot.slane %v249_v16, 4 }
  0x39   : > { %v253_v18 = vsel %vm235_vm0, %v242_v15, %v252_v17 }
  0x3a   : > { %v255_v19 = vsub.f32 %v227_v0, %v253_v18 }
  0x3c   : > { %v256_v20 = vmul.f32 1.442695, %v255_v19 }
  0x3e   : > { %525 = vpow2.f32 %v256_v20 }
  0x44   : > { %v526_v21 = vpop.eup %525 }
  0x45   : > { %259 = vst [vmem:[#allocation1] ss:$2 sm:$0xff] %v526_v21 }
  0x4c   : > { %v260_v27 = vld.sshfl [vmem:[#allocation1] sm:$0xff pattern:$0x75316420]  ;;  %v261_v28 = vld.sshfl [vmem:[#allocation1 + $0x8] sm:$0xff pattern:$0x75316420] }
  0x4d   : > { %v264_v29 = vsel %vm235_vm0, %v260_v27, 0.0  ;;  %v271_v30 = vsel %vm235_vm0, %v261_v28, 0.0  ;;  %294 = vst [vmem:[#allocation1] ss:$2 sm:$0xff] %v227_v0 }
  0x4e   : > { %v265_v31 = vrot.slane %v264_v29, 4  ;;  %v272_v32 = vrot.slane %v271_v30, 4 }
  0x50   : > { %v266_v33 = vadd.f32 %v265_v31, %v264_v29  ;;  %v273_v34 = vadd.f32 %v272_v32, %v271_v30 }
  0x52   : > { %v267_v35 = vrot.slane %v266_v33, 2  ;;  %v274_v36 = vrot.slane %v273_v34, 2 }
  0x54   : > { %v268_v40 = vadd.f32 %v267_v35, %v266_v33  ;;  %v275_v41 = vadd.f32 %v274_v36, %v273_v34  ;;  %v295_v42 = vld.sshfl [vmem:[#allocation1] sm:$0xff pattern:$0x75316420]  ;;  %v296_v43 = vld.sshfl [vmem:[#allocation1 + $0x8] sm:$0xff pattern:$0x75316420] }
  0x55   : > { %v299_v44 = vmul.f32 %v456_v38, %v295_v42  ;;  %v300_v45 = vmul.f32 %v457_v39, %v296_v43 }
  0x56   : > { %v269_v46 = vrot.slane %v268_v40, 1  ;;  %v276_v47 = vrot.slane %v275_v41, 1 }
  0x57   : > { %v301_v48 = vsel %vm235_vm0, %v299_v44, 0.0  ;;  %v308_v49 = vsel %vm235_vm0, %v300_v45, 0.0 }
  0x58   : > { %v270_v50 = vadd.f32 %v269_v46, %v268_v40  ;;  %v277_v51 = vadd.f32 %v276_v47, %v275_v41  ;;  %v302_v52 = vrot.slane %v301_v48, 4  ;;  %v309_v53 = vrot.slane %v308_v49, 4 }
  0x5a   : > { %527 = vlog2.f32 %v270_v50  ;;  %v303_v54 = vadd.f32 %v302_v52, %v301_v48  ;;  %v310_v55 = vadd.f32 %v309_v53, %v308_v49 }
  0x5b   : > { %529 = vlog2.f32 %v277_v51 }
  0x5c   : > { %v304_v56 = vrot.slane %v303_v54, 2  ;;  %v311_v57 = vrot.slane %v310_v55, 2 }
  0x5e   : > { %v305_v58 = vadd.f32 %v304_v56, %v303_v54  ;;  %v312_v59 = vadd.f32 %v311_v57, %v310_v55 }
  0x60   : > { %v528_v60 = vpop.eup %527  ;;  %v306_v61 = vrot.slane %v305_v58, 1  ;;  %v313_v62 = vrot.slane %v312_v59, 1 }
  0x61   : > { %v530_v63 = vpop.eup %529  ;;  %v279_v0 = vmul.f32 0.6931472, %v528_v60 }
  0x62   : > { %v281_v1 = vmul.f32 0.6931472, %v530_v63  ;;  %v307_v2 = vadd.f32 %v306_v61, %v305_v58  ;;  %v314_v3 = vadd.f32 %v313_v62, %v312_v59 }
  0x63   : > { %v282_v4 = vadd.f32 %v279_v0, %v242_v15 }
  0x64   : > { %v283_v5 = vadd.f32 %v281_v1, %v249_v16 }
  0x65   : > { %v319_v6 = vsub.f32 %v282_v4, %v307_v2 }
  0x66   : > { %v320_v7 = vsub.f32 %v283_v5, %v314_v3 }
  0x68   : > { %v323_v9 = vrot.slane %v320_v7, 7 }
  0x6a   : > { %v325_v10 = vsel %vm324_vm4, %v319_v6, %v323_v9 }
  0x6b   : > { %v327_v11 = vmul.f32 %v458_v8, %v325_v10 }
  0x6d   : > { %v329_v12 = vperm.slane %v327_v11, 0  ;;  %v330_v13 = vperm.slane %v327_v11, 1 }
  0x6f   : > { %v333_v14 = vsel %vm324_vm4, %v329_v12, 0.0  ;;  %v334_v17 = vsel %vm324_vm4, %v330_v13, 0.0 }
  0x70   : > { %v335_v18 = vadd.f32 %v334_v17, %v333_v14 }
  0x72   : > { %336 = vadd.xlane.f32.xlu0 %v335_v18 }
  0xe5   : > { %v337_v15 = vpop.xlane.xlu0 %336 }
  0xe6   : > { %v338_v16 = vrot.slane %v337_v15, 4 }
  0xe8   : > { %v339_v19 = vadd.f32 %v338_v16, %v337_v15 }
  0xea   : > { %v340_v20 = vrot.slane %v339_v19, 2 }
  0xec   : > { %v341_v21 = vadd.f32 %v340_v20, %v339_v19 }
  0xee   : > { %v342_v22 = vrot.slane %v341_v21, 1 }
  0xf0   : > { %v343_v23 = vadd.f32 %v342_v22, %v341_v21 }
  0xf2   : > { %462 = vpush %v343_v23 }
 0x123   : > { %s463_s3 = spop %462 }
 0x124   : > { %v345_v25 = vstv %s463_s3 }
 0x125   : > { %v346_v26 = vadd.f32 %v345_v25, %v318_v24 }
 0x127   : > { %348 = vst.msk [vmem:[%s220_s30] sm:$0x1] %vm225_vm5, %v346_v26 }
 0x128 PF: > { %s18_s14 = sadd.s32 1, %s645_s14   ;;  %s780_s9 = smov %s629_s10 }
 0x129   : > { %p15_p0 = scmp.ge.s32.totalorder %s18_s14, 4   ;;  %s781_s10 = smov %s633_s11 }
 0x12a   : > { %s782_s11 = smov %s712_s21  ;;  %s783_s12 = smov %s641_s13 }
 0x12b   : > { %s784_s13 = smov %s786_s16  ;;  %17 = sbr.rel (!%p15_p0) target bundleno = 6 (0x6), region = 85 }
 0x130   :  { %366 = vsyncpa [#allocation3], 1 }
 0x131   :  { %368 = vsyncpa [#allocation3 + $0x1], 1 }
 0x132   :  { %369 = vsyncpa [#allocation5], 1 }
 0x133   :  { %371 = vsyncpa [#allocation5 + $0x1], 1 }

</bundles_post_ra>
